<compile_context>
chip_gen: v5e
topology: v5e:2x2
jax: 0.10.0
libtpu: 0.0.40
codegen_flags: <defaults>
</compile_context>

<pallas_src>
import jax
import jax.numpy as jnp
from jax.experimental import pallas as pl
from jax.experimental.pallas import tpu as pltpu


_LANE_CHOICES = (1024, 512, 256, 128)  # lane-dense last dim (multiples of 128)
_MAX_BLOCK_ROWS = 1024                 # 1024 x 1024 f32 = 4 MiB per-plane block
_VMEM_LIMIT_BYTES = 48 << 20           # 2 planes x (in+out) x 2 bufs x 4 MiB = 32 MiB (+headroom)


def _complex_relu_kernel(re_ref, im_ref, ore_ref, oim_ref):
    # Pure VPU elementwise ReLU on one lane-dense f32 tile per plane.
    ore_ref[...] = jnp.maximum(re_ref[...], 0.0)
    oim_ref[...] = jnp.maximum(im_ref[...], 0.0)


def _round_up(x: int, m: int) -> int:
    return ((x + m - 1) // m) * m


@jax.jit
def complex_relu(x: jax.Array) -> jax.Array:
    """ReLU applied independently to real and imaginary parts (complex64)."""
    if x.dtype != jnp.complex64:
        # TODO(synk): complex128 would need f64 planes; TPU Pallas targets f32.
        raise NotImplementedError(f"complex_relu expects complex64, got {x.dtype}")

    orig_shape = x.shape

    # Planar contiguous f32 extracts (no interleave/stack).
    re = jnp.real(x).reshape(-1)
    im = jnp.imag(x).reshape(-1)
    n = re.shape[0]

    # Lane-dense 2-D factorization without padding whenever possible.
    lane = None
    for cand in _LANE_CHOICES:
        if n % cand == 0:
            lane = cand
            break
    if lane is None:
        # Rare fallback: element count not a multiple of 128.  Padding zeros
        # are inert under ReLU and sliced off below.
        lane = 128
        padded = _round_up(max(n, 1), lane)
        re = jnp.pad(re, (0, padded - n))
        im = jnp.pad(im, (0, padded - n))
    else:
        padded = n

    rows = padded // lane

    # Block-row selection:
    #   * large tensors: fixed 1024-row (4 MiB) blocks;
    #   * small/mid tensors: split into >= 2 grid steps (sublane-aligned) so
    #     both v7x TensorCores get work; if rows is tiny, fall back to one
    #     full-array block (block dim == array dim satisfies the layout rule).
    if rows >= 2 * _MAX_BLOCK_ROWS:
        block_rows = _MAX_BLOCK_ROWS
    else:
        block_rows = min(rows, max(8, _round_up(pl.cdiv(rows, 2), 8)))

    grid = (pl.cdiv(rows, block_rows),)

    re2d = re.reshape(rows, lane)
    im2d = im.reshape(rows, lane)

    spec = pl.BlockSpec((block_rows, lane), lambda i: (i, 0))

    out_re, out_im = pl.pallas_call(
        _complex_relu_kernel,
        out_shape=(
            jax.ShapeDtypeStruct((rows, lane), jnp.float32),
            jax.ShapeDtypeStruct((rows, lane), jnp.float32),
        ),
        grid_spec=pl.GridSpec(
            grid=grid,
            in_specs=[spec, spec],
            out_specs=(spec, spec),
        ),
        compiler_params=pltpu.CompilerParams(
            dimension_semantics=("parallel",),   # shard grid steps across v7x TCs
            vmem_limit_bytes=_VMEM_LIMIT_BYTES,  # 4 streams x 2 bufs x 4 MiB blocks
        ),
        input_output_aliases={0: 0, 1: 1},       # elementwise: reuse plane buffers
    )(re2d, im2d)

    out_re = out_re.reshape(-1)
    out_im = out_im.reshape(-1)
    if padded != n:
        out_re = out_re[:n]
        out_im = out_im[:n]

    return jax.lax.complex(out_re, out_im).reshape(orig_shape)


if __name__ == "__main__":
    key = jax.random.PRNGKey(0)
    k_re, k_im = jax.random.split(key)
    shape = (2, 4, 16, 16)  # NCHW
    x_re = jax.random.normal(k_re, shape, dtype=jnp.float32)
    x_im = jax.random.normal(k_im, shape, dtype=jnp.float32)
    x = jax.lax.complex(x_re, x_im)  # complex64

    y = jax.block_until_ready(complex_relu(x))

    # Reference check (plain JAX).
    y_ref = jax.lax.complex(jnp.maximum(x_re, 0.0), jnp.maximum(x_im, 0.0))
    assert y.shape == shape and y.dtype == jnp.complex64
    assert jnp.allclose(y, y_ref)

    print("KERNEL_OK")
</pallas_src>

<mosaic_0001>
module attributes {stable_mosaic.version = 11 : i64} {
  func.func @_complex_relu_kernel(%arg0: i32, %arg1: memref<2x1024xf32, #tpu.memory_space<vmem>>, %arg2: memref<2x1024xf32, #tpu.memory_space<vmem>>, %arg3: memref<2x1024xf32, #tpu.memory_space<vmem>>, %arg4: memref<2x1024xf32, #tpu.memory_space<vmem>>) attributes {dimension_semantics = [#tpu.dimension_semantics<parallel>], iteration_bounds = array<i64: 1>, scalar_prefetch = 0 : i64, scratch_operands = 0 : i64, tpu.core_type = #tpu.core_type<tc>, window_params = [{transform_indices = @transform_0, window_bounds = array<i64: 2, 1024>}, {transform_indices = @transform_1, window_bounds = array<i64: 2, 1024>}, {transform_indices = @transform_2, window_bounds = array<i64: 2, 1024>}, {transform_indices = @transform_3, window_bounds = array<i64: 2, 1024>}]} {
    %c0 = arith.constant 0 : index
    %c0_0 = arith.constant 0 : index
    %0 = vector.load %arg1[%c0, %c0_0] : memref<2x1024xf32, #tpu.memory_space<vmem>>, vector<2x1024xf32>
    %cst = arith.constant 0.000000e+00 : f32
    %1 = vector.broadcast %cst : f32 to vector<2x1024xf32>
    %2 = arith.maximumf %0, %1 : vector<2x1024xf32>
    %c0_1 = arith.constant 0 : index
    %c0_2 = arith.constant 0 : index
    %3 = vector.load %arg3[%c0_1, %c0_2] : memref<2x1024xf32, #tpu.memory_space<vmem>>, vector<2x1024xf32>
    tpu.vector_store %arg3[%c0_1, %c0_2], %2 {strides = array<i32>} : memref<2x1024xf32, #tpu.memory_space<vmem>>, vector<2x1024xf32>,
    %c0_3 = arith.constant 0 : index
    %c0_4 = arith.constant 0 : index
    %4 = vector.load %arg2[%c0_3, %c0_4] : memref<2x1024xf32, #tpu.memory_space<vmem>>, vector<2x1024xf32>
    %cst_5 = arith.constant 0.000000e+00 : f32
    %5 = vector.broadcast %cst_5 : f32 to vector<2x1024xf32>
    %6 = arith.maximumf %4, %5 : vector<2x1024xf32>
    %c0_6 = arith.constant 0 : index
    %c0_7 = arith.constant 0 : index
    %7 = vector.load %arg4[%c0_6, %c0_7] : memref<2x1024xf32, #tpu.memory_space<vmem>>, vector<2x1024xf32>
    tpu.vector_store %arg4[%c0_6, %c0_7], %6 {strides = array<i32>} : memref<2x1024xf32, #tpu.memory_space<vmem>>, vector<2x1024xf32>,
    return
  }
  func.func @transform_0(%arg0: i32) -> (i32, i32) {
    %c0_i32 = arith.constant 0 : i32
    %c0_i32_0 = arith.constant 0 : i32
    return %arg0, %c0_i32 : i32, i32
  }
  func.func @transform_1(%arg0: i32) -> (i32, i32) {
    %c0_i32 = arith.constant 0 : i32
    %c0_i32_0 = arith.constant 0 : i32
    return %arg0, %c0_i32 : i32, i32
  }
  func.func @transform_2(%arg0: i32) -> (i32, i32) {
    %c0_i32 = arith.constant 0 : i32
    %c0_i32_0 = arith.constant 0 : i32
    return %arg0, %c0_i32 : i32, i32
  }
  func.func @transform_3(%arg0: i32) -> (i32, i32) {
    %c0_i32 = arith.constant 0 : i32
    %c0_i32_0 = arith.constant 0 : i32
    return %arg0, %c0_i32 : i32, i32
  }
}

</mosaic_0001>

<bundles_post_ra>
// kernel: custom-call.1
= control target key start
LH: loop header
LB: loop body
LE: loop exit
PB: predicated region body
PF: predicated region fallthrough
CT: control target
= control target key end

     0   :  { %s56_s0 = inlined_call_operand.hbm [shape: c64[2,4,16,16], index: 0, kind: input, shape index: {}]   ;;  %s57_s1 = inlined_call_operand.vmem [shape: f32[2,4,16,16], index: 1, kind: output, shape index: {}]  }
   0x1   :  { %s2_s8 = scalar_lea.hbm %s56_s0, 128 }
   0x2   :  { %3 = vsyncpa [#allocation0], 0  ;;  %s5_s9 = sshll.u32 %s2_s8, 4  ;;  %s7_s12 = sshll.u32 %s57_s1, 4  ;;  %s6_s9 = int_to_ptr.hbm [resolvable:$true] %s5_s9  ;;  %s8_s12 = int_to_ptr.vmem [resolvable:$true] %s7_s12 }
   0x3   :  { %10 = dma.hbm_to_vmem [thread:$0]  %s6_s9, 2048, %s8_s12, [#allocation0] }
   0x4   :  { %38 = dma.done.wait [#allocation0], 2048  }
   0x5   :  { %39 = vsyncadd [#allocation0], 4294965248 }
   0x6   :  { %13 = vsyncpa [#allocation0], 1 }

// kernel: custom-call
= control target key start
LH: loop header
LB: loop body
LE: loop exit
PB: predicated region body
PF: predicated region fallthrough
CT: control target
= control target key end

     0   :  { %2 = vsyncpa [#allocation0], 0  ;;  %s55_s0 = inlined_call_operand.hbm [shape: c64[2,4,16,16], index: 0, kind: input, shape index: {}]   ;;  %s56_s1 = inlined_call_operand.vmem [shape: f32[2,4,16,16], index: 1, kind: output, shape index: {}]  }
   0x1   :  { %s4_s8 = sshll.u32 %s55_s0, 4  ;;  %s6_s11 = sshll.u32 %s56_s1, 4  ;;  %s5_s8 = int_to_ptr.hbm [resolvable:$true] %s4_s8  ;;  %s7_s11 = int_to_ptr.vmem [resolvable:$true] %s6_s11 }
   0x2   :  { %9 = dma.hbm_to_vmem [thread:$0]  %s5_s8, 2048, %s7_s11, [#allocation0] }
   0x3   :  { %37 = dma.done.wait [#allocation0], 2048  }
   0x4   :  { %38 = vsyncadd [#allocation0], 4294965248 }
   0x5   :  { %12 = vsyncpa [#allocation0], 1 }

// kernel: custom-call.2
= control target key start
LH: loop header
LB: loop body
LE: loop exit
PB: predicated region body
PF: predicated region fallthrough
CT: control target
= control target key end

     0   :  { %s105_s0 = inlined_call_operand.vmem [shape: f32[2,4,16,16], index: 0, kind: input, shape index: {}]   ;;  %s106_s1 = inlined_call_operand.vmem [shape: f32[2,4,16,16], index: 1, kind: input, shape index: {}]   ;;  %s107_s2 = inlined_call_operand.hbm [shape: c64[2,4,16,16], index: 2, kind: output, shape index: {}]  }
   0x1   :  { %s3_s11 = scalar_lea.hbm %s107_s2, 128 }
   0x2   :  { %4 = vsyncpa [#allocation0], 0  ;;  %s6_s14 = sshll.u32 %s105_s0, 4  ;;  %s8_s17 = sshll.u32 %s107_s2, 4  ;;  %s7_s14 = int_to_ptr.vmem [resolvable:$true] %s6_s14  ;;  %s9_s17 = int_to_ptr.hbm [resolvable:$true] %s8_s17 }
   0x3   :  { %11 = dma.vmem_to_hbm [thread:$0]  %s7_s14, 2048, %s9_s17, [#allocation0] }
   0x4   :  { %74 = dma.done.wait [#allocation0], 2048  }
   0x5   :  { %75 = vsyncadd [#allocation0], 4294965248 }
   0x6   :  { %14 = vsyncpa [#allocation0], 1 }
   0x7   :  { %15 = vsyncpa [#allocation1], 0  ;;  %s17_s20 = sshll.u32 %s106_s1, 4  ;;  %s19_s21 = sshll.u32 %s3_s11, 4  ;;  %s18_s20 = int_to_ptr.vmem [resolvable:$true] %s17_s20  ;;  %s20_s21 = int_to_ptr.hbm [resolvable:$true] %s19_s21 }
   0x8   :  { %22 = dma.vmem_to_hbm [thread:$0]  %s18_s20, 2048, %s20_s21, [#allocation1] }
   0x9   :  { %76 = dma.done.wait [#allocation1], 2048  }
   0xa   :  { %77 = vsyncadd [#allocation1], 4294965248 }
   0xb   :  { %25 = vsyncpa [#allocation1], 1 }

// kernel: complex_relu.1
= control target key start
LH: loop header
LB: loop body
LE: loop exit
PB: predicated region body
PF: predicated region fallthrough
CT: control target
= control target key end

     0   :  { %s77_s0 = inlined_call_operand.vmem [shape: f32[2,1024], index: 0, kind: input, shape index: {}, may-alias: {0,2}]   ;;  %s78_s1 = inlined_call_operand.vmem [shape: f32[2,1024], index: 1, kind: input, shape index: {}, may-alias: {1,3}]   ;;  %s79_s2 = inlined_call_operand.vmem [shape: f32[2,1024], index: 2, kind: output, shape index: {0}, may-alias: {0,2}]   ;;  %s80_s3 = inlined_call_operand.vmem [shape: f32[2,1024], index: 3, kind: output, shape index: {1}, may-alias: {1,3}]  }
   0x1   :  { %v13_v0 = vld [vmem:[%s77_s0] sm:$0xff]  ;;  %v14_v1 = vld [vmem:[%s77_s0 + $0x8] sm:$0xff] }
   0x2   :  { %v19_v2 = vld [vmem:[%s78_s1] sm:$0xff]  ;;  %v15_v3 = vmax.f32 %v13_v0, 0.0  ;;  %v16_v4 = vmax.f32 %v14_v1, 0.0  ;;  %v20_v6 = vld [vmem:[%s78_s1 + $0x8] sm:$0xff] }
   0x3   :  { %v21_v5 = vmax.f32 %v19_v2, 0.0  ;;  %v22_v7 = vmax.f32 %v20_v6, 0.0 }
   0x4   :  { %17 = vst [vmem:[%s79_s2] sm:$0xff] %v15_v3 }
   0x5   :  { %18 = vst [vmem:[%s79_s2 + $0x8] sm:$0xff] %v16_v4 }
   0x6   :  { %23 = vst [vmem:[%s80_s3] sm:$0xff] %v21_v5 }
   0x7   :  { %24 = vst [vmem:[%s80_s3 + $0x8] sm:$0xff] %v22_v7 }

</bundles_post_ra>
